<compile_context>
chip_gen: v7x
topology: tpu7x:2x2x1
jax: 0.10.0
libtpu: 0.0.40
codegen_flags: <defaults>
</compile_context>

<pallas_src>
import jax
import jax.numpy as jnp
from jax.experimental import pallas as pl
from jax.experimental.pallas import tpu as pltpu


def gru_encoder_kernel(ids_ref,   # VMEM (B_pad, 1)  int32  token ids
                       eih_ref,   # VMEM (V, 3D)     f32    emb @ W_ih^T + b_ih
                       whh_ref,   # VMEM (D, 3D)     f32    W_hh^T
                       bhh_ref,   # VMEM (1, 3D)     f32    b_hh
                       h_ref,     # VMEM (B_pad, D)  f32    previous hidden
                       out_ref):  # VMEM (B_pad, D)  f32    new hidden
    B, D = h_ref.shape
    V = eih_ref.shape[0]

    # ---- one-hot MXU gather of the fused input projection --------------------
    ids = ids_ref[...]                                              # (B, 1) i32
    vocab_iota = jax.lax.broadcasted_iota(jnp.int32, (B, V), 1)     # (B, V)
    one_hot = (vocab_iota == ids).astype(jnp.float32)               # (B, V)
    gi = jnp.dot(one_hot, eih_ref[...],
                 preferred_element_type=jnp.float32)                # (B, 3D)

    # ---- hidden-side projection on the MXU ------------------------------------
    h = h_ref[...]                                                  # (B, D)
    gh = jnp.dot(h, whh_ref[...],
                 preferred_element_type=jnp.float32) + bhh_ref[...]  # (B, 3D)

    # ---- GRU gates (PyTorch order [r, z, n]); slices lie on 128-lane bounds ---
    i_r, i_z, i_n = gi[:, :D], gi[:, D:2 * D], gi[:, 2 * D:]
    h_r, h_z, h_n = gh[:, :D], gh[:, D:2 * D], gh[:, 2 * D:]

    r = jax.nn.sigmoid(i_r + h_r)
    z = jax.nn.sigmoid(i_z + h_z)
    n = jnp.tanh(i_n + r * h_n)
    out_ref[...] = (1.0 - z) * n + z * h                            # (B, D)


def rnn_encoder_forward(input_ids, hidden_state, kernel_params):
    """input_ids: (B,) int32, hidden_state: (1, B, D) f32 -> (output, hidden)."""
    e_ih, whh_t, bhh = kernel_params
    V, three_d = e_ih.shape
    D = three_d // 3
    B = input_ids.shape[0]
    B_pad = max(8, ((B + 7) // 8) * 8)           # full sublane occupancy

    ids = jnp.zeros((B_pad, 1), jnp.int32).at[:B, 0].set(input_ids.astype(jnp.int32))
    h0 = jnp.zeros((B_pad, D), jnp.float32).at[:B].set(
        hidden_state.reshape(B, D).astype(jnp.float32))

    h_new = pl.pallas_call(
        gru_encoder_kernel,
        out_shape=jax.ShapeDtypeStruct((B_pad, D), jnp.float32),
        grid=(1,),
        in_specs=[
            pl.BlockSpec((B_pad, 1), lambda i: (0, 0)),       # token ids
            pl.BlockSpec((V, three_d), lambda i: (0, 0)),     # fused E_ih (resident)
            pl.BlockSpec((D, three_d), lambda i: (0, 0)),     # W_hh^T
            pl.BlockSpec((1, three_d), lambda i: (0, 0)),     # b_hh
            pl.BlockSpec((B_pad, D), lambda i: (0, 0)),       # hidden
        ],
        out_specs=pl.BlockSpec((B_pad, D), lambda i: (0, 0)),
        compiler_params=pltpu.CompilerParams(
            dimension_semantics=("arbitrary",)),
    )(ids, e_ih, whh_t, bhh, h0)

    # PyTorch GRU returns output (seq=1, B, D) and hidden (1, B, D);
    # for seq_len == 1 they are identical -> duplicate in the wrapper.
    out = h_new[:B].reshape(1, B, D)
    return out, out


def init_params(key, input_size, n_dim):
    """Raw f32 parameters with PyTorch-module shapes (weights kept transposed)."""
    k_emb, k_wih, k_whh, k_bih, k_bhh = jax.random.split(key, 5)
    emb = jax.random.normal(k_emb, (input_size, n_dim), dtype=jnp.float32)
    bound = 1.0 / jnp.sqrt(jnp.float32(n_dim))
    wih = jax.random.uniform(k_wih, (3 * n_dim, n_dim), jnp.float32, -bound, bound)
    whh = jax.random.uniform(k_whh, (3 * n_dim, n_dim), jnp.float32, -bound, bound)
    bih = jax.random.uniform(k_bih, (1, 3 * n_dim), jnp.float32, -bound, bound)
    bhh = jax.random.uniform(k_bhh, (1, 3 * n_dim), jnp.float32, -bound, bound)
    return emb, wih.T, whh.T, bih, bhh


def prepare_kernel_params(raw_params):
    """Algebraic fusion of embedding + input projection into one table."""
    emb, wih_t, whh_t, bih, bhh = raw_params
    e_ih = jnp.dot(emb, wih_t) + bih          # (V, 3D): emb @ W_ih^T + b_ih
    return (e_ih.astype(jnp.float32),
            whh_t.astype(jnp.float32),        # (D, 3D) kept in f32
            bhh.astype(jnp.float32))


def reference_forward(input_ids, hidden_state, raw_params):
    """Pure-JAX f32 reference with PyTorch GRU semantics."""
    emb, wih_t, whh_t, bih, bhh = raw_params
    B = input_ids.shape[0]
    D = emb.shape[1]
    x = emb[input_ids]                                   # (B, D)
    h = hidden_state.reshape(B, D)
    gi = x @ wih_t + bih
    gh = h @ whh_t + bhh
    i_r, i_z, i_n = gi[:, :D], gi[:, D:2 * D], gi[:, 2 * D:]
    h_r, h_z, h_n = gh[:, :D], gh[:, D:2 * D], gh[:, 2 * D:]
    r = jax.nn.sigmoid(i_r + h_r)
    z = jax.nn.sigmoid(i_z + h_z)
    n = jnp.tanh(i_n + r * h_n)
    h_new = (1.0 - z) * n + z * h
    return h_new.reshape(1, B, D), h_new.reshape(1, B, D)


if __name__ == "__main__":
    # Small shapes consistent with the module: vocab=512, n_dim=128, batch=4, seq=1.
    VOCAB = 512
    N_DIM = 128
    BATCH = 4

    key = jax.random.PRNGKey(0)
    k_params, k_ids, k_h = jax.random.split(key, 3)

    raw_params = init_params(k_params, VOCAB, N_DIM)
    kernel_params = prepare_kernel_params(raw_params)

    input_ids = jax.random.randint(k_ids, (BATCH,), 0, VOCAB, dtype=jnp.int32)
    # Module's init_state() is zeros; use a non-trivial hidden to exercise the GRU path.
    hidden0 = jax.random.normal(k_h, (1, BATCH, N_DIM), dtype=jnp.float32)

    output, hidden = rnn_encoder_forward(input_ids, hidden0, kernel_params)
    jax.block_until_ready((output, hidden))

    ref_out, ref_hid = reference_forward(input_ids, hidden0, raw_params)

    assert output.shape == (1, BATCH, N_DIM)
    assert hidden.shape == (1, BATCH, N_DIM)
    assert bool(jnp.all(jnp.isfinite(output)))
    # All storage is f32; tolerance covers default MXU f32 matmul precision.
    assert bool(jnp.allclose(output, ref_out, atol=2e-2, rtol=2e-2))
    assert bool(jnp.allclose(hidden, ref_hid, atol=2e-2, rtol=2e-2))
    print("KERNEL_OK")
</pallas_src>

<mosaic_0001>
module attributes {stable_mosaic.version = 11 : i64} {
  func.func @gru_encoder_kernel(%arg0: i32, %arg1: memref<8x1xi32, #tpu.memory_space<vmem>>, %arg2: memref<512x384xf32, #tpu.memory_space<vmem>>, %arg3: memref<128x384xf32, #tpu.memory_space<vmem>>, %arg4: memref<1x384xf32, #tpu.memory_space<vmem>>, %arg5: memref<8x128xf32, #tpu.memory_space<vmem>>, %arg6: memref<8x128xf32, #tpu.memory_space<vmem>>) attributes {dimension_semantics = [#tpu.dimension_semantics<arbitrary>], iteration_bounds = array<i64: 1>, scalar_prefetch = 0 : i64, scratch_operands = 0 : i64, tpu.core_type = #tpu.core_type<tc>, window_params = [{pipeline_mode = #tpu.pipeline_mode<synchronous>, transform_indices = @transform_0, window_bounds = array<i64: 8, 1>}, {pipeline_mode = #tpu.pipeline_mode<synchronous>, transform_indices = @transform_1, window_bounds = array<i64: 512, 384>}, {pipeline_mode = #tpu.pipeline_mode<synchronous>, transform_indices = @transform_2, window_bounds = array<i64: 128, 384>}, {pipeline_mode = #tpu.pipeline_mode<synchronous>, transform_indices = @transform_3, window_bounds = array<i64: 1, 384>}, {pipeline_mode = #tpu.pipeline_mode<synchronous>, transform_indices = @transform_4, window_bounds = array<i64: 8, 128>}, {pipeline_mode = #tpu.pipeline_mode<synchronous>, transform_indices = @transform_5, window_bounds = array<i64: 8, 128>}]} {
    %c0 = arith.constant 0 : index
    %c0_0 = arith.constant 0 : index
    %0 = vector.load %arg1[%c0, %c0_0] : memref<8x1xi32, #tpu.memory_space<vmem>>, vector<8x1xi32>
    %1 = tpu.iota {dimensions = array<i32: 1>} : vector<8x512xi32>
    %2 = vector.broadcast %0 : vector<8x1xi32> to vector<8x512xi32>
    %3 = arith.cmpi eq, %1, %2 : vector<8x512xi32>
    %4 = arith.extui %3 : vector<8x512xi1> to vector<8x512xi32>
    %5 = arith.sitofp %4 : vector<8x512xi32> to vector<8x512xf32>
    %c0_1 = arith.constant 0 : index
    %c0_2 = arith.constant 0 : index
    %6 = vector.load %arg2[%c0_1, %c0_2] : memref<512x384xf32, #tpu.memory_space<vmem>>, vector<512x384xf32>
    %cst = arith.constant dense<0.000000e+00> : vector<8x384xf32>
    %7 = tpu.matmul %5, %6, %cst {dimension_numbers = #tpu.dot_dimension_numbers<[1], [0], [0], [1], [0, 0, 1, 1], [], []>} : vector<8x512xf32>, vector<512x384xf32>, vector<8x384xf32> -> vector<8x384xf32>
    %c0_3 = arith.constant 0 : index
    %c0_4 = arith.constant 0 : index
    %8 = vector.load %arg5[%c0_3, %c0_4] : memref<8x128xf32, #tpu.memory_space<vmem>>, vector<8x128xf32>
    %c0_5 = arith.constant 0 : index
    %c0_6 = arith.constant 0 : index
    %9 = vector.load %arg3[%c0_5, %c0_6] : memref<128x384xf32, #tpu.memory_space<vmem>>, vector<128x384xf32>
    %cst_7 = arith.constant dense<0.000000e+00> : vector<8x384xf32>
    %10 = tpu.matmul %8, %9, %cst_7 {dimension_numbers = #tpu.dot_dimension_numbers<[1], [0], [0], [1], [0, 0, 1, 1], [], []>} : vector<8x128xf32>, vector<128x384xf32>, vector<8x384xf32> -> vector<8x384xf32>
    %c0_8 = arith.constant 0 : index
    %c0_9 = arith.constant 0 : index
    %11 = vector.load %arg4[%c0_8, %c0_9] : memref<1x384xf32, #tpu.memory_space<vmem>>, vector<1x384xf32>
    %12 = vector.broadcast %11 : vector<1x384xf32> to vector<8x384xf32>
    %13 = arith.addf %10, %12 : vector<8x384xf32>
    %14 = vector.extract_strided_slice %7 {offsets = [0, 0], sizes = [8, 128], strides = [1, 1]} : vector<8x384xf32> to vector<8x128xf32>
    %15 = vector.extract_strided_slice %7 {offsets = [0, 128], sizes = [8, 128], strides = [1, 1]} : vector<8x384xf32> to vector<8x128xf32>
    %16 = vector.extract_strided_slice %7 {offsets = [0, 256], sizes = [8, 128], strides = [1, 1]} : vector<8x384xf32> to vector<8x128xf32>
    %17 = vector.extract_strided_slice %13 {offsets = [0, 0], sizes = [8, 128], strides = [1, 1]} : vector<8x384xf32> to vector<8x128xf32>
    %18 = vector.extract_strided_slice %13 {offsets = [0, 128], sizes = [8, 128], strides = [1, 1]} : vector<8x384xf32> to vector<8x128xf32>
    %19 = vector.extract_strided_slice %13 {offsets = [0, 256], sizes = [8, 128], strides = [1, 1]} : vector<8x384xf32> to vector<8x128xf32>
    %20 = arith.addf %14, %17 : vector<8x128xf32>
    %21 = arith.negf %20 : vector<8x128xf32>
    %22 = math.exp %21 : vector<8x128xf32>
    %cst_10 = arith.constant 1.000000e+00 : f32
    %23 = vector.broadcast %cst_10 : f32 to vector<8x128xf32>
    %24 = arith.addf %23, %22 : vector<8x128xf32>
    %25 = arith.divf %23, %24 : vector<8x128xf32>
    %26 = arith.addf %15, %18 : vector<8x128xf32>
    %27 = arith.negf %26 : vector<8x128xf32>
    %28 = math.exp %27 : vector<8x128xf32>
    %cst_11 = arith.constant 1.000000e+00 : f32
    %29 = vector.broadcast %cst_11 : f32 to vector<8x128xf32>
    %30 = arith.addf %29, %28 : vector<8x128xf32>
    %31 = arith.divf %29, %30 : vector<8x128xf32>
    %32 = arith.mulf %25, %19 : vector<8x128xf32>
    %33 = arith.addf %16, %32 : vector<8x128xf32>
    %34 = math.tanh %33 : vector<8x128xf32>
    %cst_12 = arith.constant 1.000000e+00 : f32
    %35 = vector.broadcast %cst_12 : f32 to vector<8x128xf32>
    %36 = arith.subf %35, %31 : vector<8x128xf32>
    %37 = arith.mulf %36, %34 : vector<8x128xf32>
    %38 = arith.mulf %31, %8 : vector<8x128xf32>
    %39 = arith.addf %37, %38 : vector<8x128xf32>
    %c0_13 = arith.constant 0 : index
    %c0_14 = arith.constant 0 : index
    %40 = vector.load %arg6[%c0_13, %c0_14] : memref<8x128xf32, #tpu.memory_space<vmem>>, vector<8x128xf32>
    tpu.vector_store %arg6[%c0_13, %c0_14], %39 {strides = array<i32>} : memref<8x128xf32, #tpu.memory_space<vmem>>, vector<8x128xf32>,
    return
  }
  func.func @transform_0(%arg0: i32) -> (i32, i32) {
    %c0_i32 = arith.constant 0 : i32
    %c0_i32_0 = arith.constant 0 : i32
    %c0_i32_1 = arith.constant 0 : i32
    return %c0_i32, %c0_i32_0 : i32, i32
  }
  func.func @transform_1(%arg0: i32) -> (i32, i32) {
    %c0_i32 = arith.constant 0 : i32
    %c0_i32_0 = arith.constant 0 : i32
    %c0_i32_1 = arith.constant 0 : i32
    return %c0_i32, %c0_i32_0 : i32, i32
  }
  func.func @transform_2(%arg0: i32) -> (i32, i32) {
    %c0_i32 = arith.constant 0 : i32
    %c0_i32_0 = arith.constant 0 : i32
    %c0_i32_1 = arith.constant 0 : i32
    return %c0_i32, %c0_i32_0 : i32, i32
  }
  func.func @transform_3(%arg0: i32) -> (i32, i32) {
    %c0_i32 = arith.constant 0 : i32
    %c0_i32_0 = arith.constant 0 : i32
    %c0_i32_1 = arith.constant 0 : i32
    return %c0_i32, %c0_i32_0 : i32, i32
  }
  func.func @transform_4(%arg0: i32) -> (i32, i32) {
    %c0_i32 = arith.constant 0 : i32
    %c0_i32_0 = arith.constant 0 : i32
    %c0_i32_1 = arith.constant 0 : i32
    return %c0_i32, %c0_i32_0 : i32, i32
  }
  func.func @transform_5(%arg0: i32) -> (i32, i32) {
    %c0_i32 = arith.constant 0 : i32
    %c0_i32_0 = arith.constant 0 : i32
    %c0_i32_1 = arith.constant 0 : i32
    return %c0_i32, %c0_i32_0 : i32, i32
  }
}

</mosaic_0001>

<bundles_post_ra>
// kernel: tpu_custom_call.1
= control target key start
LH: loop header
LB: loop body
LE: loop exit
PB: predicated region body
PF: predicated region fallthrough
CT: control target
= control target key end

     0   :  { %10 = vsyncpa [#allocation3], 0  ;;  %s1395_s0 = inlined_call_operand.vmem [shape: s32[8,1], index: 0, kind: input, shape index: {}]   ;;  %s1396_s1 = inlined_call_operand.hbm [shape: f32[512,384], index: 1, kind: input, shape index: {}]   ;;  %s1397_s2 = inlined_call_operand.hbm [shape: f32[128,384], index: 2, kind: input, shape index: {}]   ;;  %s1398_s3 = inlined_call_operand.vmem [shape: f32[1,384], index: 3, kind: input, shape index: {}]   ;;  %s1399_s4 = inlined_call_operand.vmem [shape: f32[8,128], index: 4, kind: input, shape index: {}]   ;;  %s1400_s5 = inlined_call_operand.hbm [shape: f32[8,128], index: 5, kind: output, shape index: {}]  }
   0x1   :  { %11 = vsyncpa [#allocation6], 0 }
   0x2   :  { %12 = vsyncpa [#allocation4], 0  ;;  %s1272_s18 = smov [#allocation2]   ;;  %s1200_s22 = scalar_lea.hbm %s1396_s1, 24576 }
   0x3   :  { %s20_s19 = sshll.u32 %s1272_s18, 4  ;;  %p1201_p0 = scmp.ne.s32.totalorder %s1396_s1, %s1200_s22  ;;  %s21_s19 = int_to_ptr.vmem [resolvable:$true] %s20_s19 }
   0x4   :  { %p1204_p1 = scmp.lt.u32.totalorder %s1200_s22, %s1396_s1 }
   0x6   :  { %p1206_p2 = pnand %p1204_p1, %p1201_p0 }
   0x8   :  { %1209 = shalt.err (!%p1206_p2)
}
   0x9   :  { %s1210_s27 = scalar_lea.vmem %s21_s19, 24576  ;;  %p1215_p4 = scmp.lt.s32.totalorder %s21_s19, %s21_s19 }
   0xa   :  { %p1211_p3 = scmp.ne.s32.totalorder %s21_s19, %s1210_s27  ;;  %p1216_p5 = scmp.lt.s32.totalorder %s1210_s27, %s1210_s27 }
   0xc   :  { %p1217_p6 = por %p1216_p5, %p1215_p4 }
   0xe   :  { %p1218_p7 = pnand %p1217_p6, %p1211_p3 }
  0x10   :  { %1221 = shalt.err (!%p1218_p7)
}
  0x11   :  { %s1273_s28 = smov 384   ;;  %s1274_s29 = smov 24  }
  0x12   :  { %26 = dma.hbm_to_vmem [thread:$0]  %s1396_s1, 24576, %s21_s19, [#allocation3], %s1273_s28, %s1273_s28, %s1274_s29  }
  0x13   :  { %s1275_s7 = smov [#allocation5]   ;;  %s1222_s11 = scalar_lea.hbm %s1397_s2, 6144 }
  0x14   :  { %s32_s8 = sshll.u32 %s1275_s7, 4  ;;  %p1223_p8 = scmp.ne.s32.totalorder %s1397_s2, %s1222_s11  ;;  %s33_s8 = int_to_ptr.vmem [resolvable:$true] %s32_s8 }
  0x15   :  { %p1226_p9 = scmp.lt.u32.totalorder %s1222_s11, %s1397_s2 }
  0x17   :  { %p1228_p10 = pnand %p1226_p9, %p1223_p8 }
  0x19   :  { %1231 = shalt.err (!%p1228_p10)
}
  0x1a   :  { %s1232_s16 = scalar_lea.vmem %s33_s8, 6144  ;;  %p1237_p12 = scmp.lt.s32.totalorder %s33_s8, %s33_s8 }
  0x1b   :  { %p1233_p11 = scmp.ne.s32.totalorder %s33_s8, %s1232_s16  ;;  %p1238_p13 = scmp.lt.s32.totalorder %s1232_s16, %s1232_s16 }
  0x1d   :  { %p1239_p0 = por %p1238_p13, %p1237_p12 }
  0x1f   :  { %p1240_p1 = pnand %p1239_p0, %p1233_p11 }
  0x21   :  { %1243 = shalt.err (!%p1240_p1)
}
  0x22   :  { %38 = dma.hbm_to_vmem [thread:$0]  %s1397_s2, 6144, %s33_s8, [#allocation6], %s1273_s28, %s1273_s28, %s1274_s29  }
  0x23   :  { %1266 = dma.done.wait [#allocation3], 24576  }
  0x24   :  { %1267 = vsyncadd [#allocation3], 4294942720 }
  0x25   :  { %1268 = dma.done.wait [#allocation6], 6144  }
  0x26   :  { %1269 = vsyncadd [#allocation6], 4294961152  ;;  %v1276_v0 = vmov 0   ;;  %v49_v1 = vld [vmem:[%s1395_s0] sm:$0xff]  ;;  %v71_v2 = vld [vmem:[#allocation2 + $0x8] sm:$0xff]  ;;  %vm1280_vm4 = vmmov 0  }
  0x27   :  { %1189 = vset.pattern.permute.xlu0 %v1276_v0  ;;  %v74_v3 = vld [vmem:[#allocation2 + $0x20] sm:$0xff]  ;;  %v73_v6 = vld [vmem:[#allocation2 + $0x18] sm:$0xff]  ;;  %v80_v9 = vld [vmem:[#allocation2 + $0x50] sm:$0xff] }
  0x28   :  { %56 = vperm.xlu0 %1189, %v49_v1   ;;  %v925_v4 = vpack.c.bf16 %v74_v3, %v71_v2  ;;  %v70_v5 = vld [vmem:[#allocation2] sm:$0xff]  ;;  %v77_v7 = vld [vmem:[#allocation2 + $0x38] sm:$0xff]  ;;  %v76_v10 = vld [vmem:[#allocation2 + $0x30] sm:$0xff] }
  0x29   :  { %v927_v8 = vpack.c.bf16 %v73_v6, %v70_v5  ;;  %v79_v11 = vld [vmem:[#allocation2 + $0x48] sm:$0xff]  ;;  %v929_v12 = vpack.c.bf16 %v80_v9, %v77_v7  ;;  %v86_v14 = vld [vmem:[#allocation2 + $0x80] sm:$0xff]  ;;  %v85_v18 = vld [vmem:[#allocation2 + $0x78] sm:$0xff] }
  0x2a   :  { %926 = vmatprep.subr.bf16.mxu0 %v925_v4  ;;  %v83_v13 = vld [vmem:[#allocation2 + $0x68] sm:$0xff]  ;;  %v931_v15 = vpack.c.bf16 %v79_v11, %v76_v10  ;;  %v82_v17 = vld [vmem:[#allocation2 + $0x60] sm:$0xff]  ;;  %v89_v19 = vld [vmem:[#allocation2 + $0x98] sm:$0xff] }
  0x2b   :  { %928 = vmatpush1.bf16.msra.mxu0 %v927_v8  ;;  %v933_v16 = vpack.c.bf16 %v86_v14, %v83_v13  ;;  %v92_v20 = vld [vmem:[#allocation2 + $0xb0] sm:$0xff]  ;;  %v935_v21 = vpack.c.bf16 %v85_v18, %v82_v17  ;;  %v91_v24 = vld [vmem:[#allocation2 + $0xa8] sm:$0xff]  ;;  %v98_v26 = vld [vmem:[#allocation2 + $0xe0] sm:$0xff] }
  0x2c   :  { %930 = vmatprep.subr.bf16.mxu0 %v929_v12  ;;  %v937_v22 = vpack.c.bf16 %v92_v20, %v89_v19  ;;  %v88_v23 = vld [vmem:[#allocation2 + $0x90] sm:$0xff]  ;;  %v95_v25 = vld [vmem:[#allocation2 + $0xc8] sm:$0xff]  ;;  %v94_v29 = vld [vmem:[#allocation2 + $0xc0] sm:$0xff] }
  0x2d   :  { %v120_v27 = vld [vmem:[#allocation2 + $0x190] sm:$0xff]  ;;  %v939_v28 = vpack.c.bf16 %v91_v24, %v88_v23  ;;  %v97_v30 = vld [vmem:[#allocation2 + $0xd8] sm:$0xff]  ;;  %v123_v31 = vld [vmem:[#allocation2 + $0x1a8] sm:$0xff]  ;;  %v941_v32 = vpack.c.bf16 %v98_v26, %v95_v25 }
  0x2e   :  { %v101_v33 = vld [vmem:[#allocation2 + $0xf8] sm:$0xff]  ;;  %v1053_v34 = vpack.c.bf16 %v123_v31, %v120_v27  ;;  %v72_v35 = vld [vmem:[#allocation2 + $0x10] sm:$0xff]  ;;  %v75_v36 = vld [vmem:[#allocation2 + $0x28] sm:$0xff]  ;;  %v943_v43 = vpack.c.bf16 %v97_v30, %v94_v29 }
  0x2f   :  { %932 = vmatpush1.bf16.msra.mxu0 %v931_v15  ;;  %v104_v37 = vld [vmem:[#allocation2 + $0x110] sm:$0xff]  ;;  %v1055_v38 = vpack.c.bf16 %v75_v36, %v72_v35  ;;  %v126_v39 = vld [vmem:[#allocation2 + $0x1c0] sm:$0xff]  ;;  %v129_v40 = vld [vmem:[#allocation2 + $0x1d8] sm:$0xff] }
  0x30   :  { %934 = vmatprep.subr.bf16.mxu0 %v933_v16  ;;  %1054 = vmatprep.subr.bf16.mxu1 %v1053_v34  ;;  %v1057_v41 = vpack.c.bf16 %v129_v40, %v126_v39  ;;  %v78_v42 = vld [vmem:[#allocation2 + $0x40] sm:$0xff]  ;;  %v100_v44 = vld [vmem:[#allocation2 + $0xf0] sm:$0xff]  ;;  %v103_v45 = vld [vmem:[#allocation2 + $0x108] sm:$0xff]  ;;  %v945_v47 = vpack.c.bf16 %v104_v37, %v101_v33 }
  0x31   :  { %1056 = vmatpush3.bf16.msra.mxu1 %v1055_v38  ;;  %v81_v46 = vld [vmem:[#allocation2 + $0x58] sm:$0xff]  ;;  %v107_v48 = vld [vmem:[#allocation2 + $0x128] sm:$0xff]  ;;  %v132_v50 = vld [vmem:[#allocation2 + $0x1f0] sm:$0xff]  ;;  %v947_v57 = vpack.c.bf16 %v103_v45, %v100_v44 }
  0x32   :  { %1058 = vmatprep.subr.bf16.mxu1 %v1057_v41  ;;  %v1059_v49 = vpack.c.bf16 %v81_v46, %v78_v42  ;;  %v135_v51 = vld [vmem:[#allocation2 + $0x208] sm:$0xff]  ;;  %v110_v52 = vld [vmem:[#allocation2 + $0x140] sm:$0xff]  ;;  %v84_v54 = vld [vmem:[#allocation2 + $0x70] sm:$0xff] }
  0x33   :  { %936 = vmatpush1.bf16.msra.mxu0 %v935_v21  ;;  %v1061_v53 = vpack.c.bf16 %v135_v51, %v132_v50  ;;  %v87_v55 = vld [vmem:[#allocation2 + $0x88] sm:$0xff]  ;;  %v138_v56 = vld [vmem:[#allocation2 + $0x220] sm:$0xff]  ;;  %v109_v59 = vld [vmem:[#allocation2 + $0x138] sm:$0xff]  ;;  %v949_v62 = vpack.c.bf16 %v110_v52, %v107_v48 }
  0x34   :  { %938 = vmatprep.subr.bf16.mxu0 %v937_v22  ;;  %v106_v58 = vld [vmem:[#allocation2 + $0x120] sm:$0xff]  ;;  %v1063_v60 = vpack.c.bf16 %v87_v55, %v84_v54  ;;  %v141_v61 = vld [vmem:[#allocation2 + $0x238] sm:$0xff]  ;;  %v116_v3 = vld [vmem:[#allocation2 + $0x170] sm:$0xff] }
  0x35   :  { %1060 = vmatpush3.bf16.msra.mxu1 %v1059_v49  ;;  %v113_v63 = vld [vmem:[#allocation2 + $0x158] sm:$0xff]  ;;  %v1065_v0 = vpack.c.bf16 %v141_v61, %v138_v56  ;;  %v90_v1 = vld [vmem:[#allocation2 + $0xa0] sm:$0xff]  ;;  %v144_v4 = vld [vmem:[#allocation2 + $0x250] sm:$0xff]  ;;  %v951_v6 = vpack.c.bf16 %v109_v59, %v106_v58 }
  0x36   :  { %1062 = vmatprep.subr.bf16.mxu1 %v1061_v53  ;;  %v93_v2 = vld [vmem:[#allocation2 + $0xb8] sm:$0xff]  ;;  %v147_v5 = vld [vmem:[#allocation2 + $0x268] sm:$0xff]  ;;  %v112_v7 = vld [vmem:[#allocation2 + $0x150] sm:$0xff]  ;;  %v953_v10 = vpack.c.bf16 %v116_v3, %v113_v63 }
  0x37   :  { %940 = vmatpush1.bf16.msra.mxu0 %v939_v28  ;;  %v115_v8 = vld [vmem:[#allocation2 + $0x168] sm:$0xff]  ;;  %v1067_v9 = vpack.c.bf16 %v93_v2, %v90_v1  ;;  %v1069_v12 = vpack.c.bf16 %v147_v5, %v144_v4  ;;  %v96_v13 = vld [vmem:[#allocation2 + $0xd0] sm:$0xff]  ;;  %v122_v15 = vld [vmem:[#allocation2 + $0x1a0] sm:$0xff] }
  0x38   :  { %942 = vmatprep.subr.bf16.mxu0 %v941_v32  ;;  %v119_v11 = vld [vmem:[#allocation2 + $0x188] sm:$0xff]  ;;  %v150_v16 = vld [vmem:[#allocation2 + $0x280] sm:$0xff]  ;;  %v153_v17 = vld [vmem:[#allocation2 + $0x298] sm:$0xff]  ;;  %v955_v18 = vpack.c.bf16 %v115_v8, %v112_v7 }
  0x39   :  { %1064 = vmatpush3.bf16.msra.mxu1 %v1063_v60  ;;  %v99_v14 = vld [vmem:[#allocation2 + $0xe8] sm:$0xff]  ;;  %v118_v19 = vld [vmem:[#allocation2 + $0x180] sm:$0xff]  ;;  %v121_v20 = vld [vmem:[#allocation2 + $0x198] sm:$0xff]  ;;  %v957_v22 = vpack.c.bf16 %v122_v15, %v119_v11  ;;  %v1073_v24 = vpack.c.bf16 %v153_v17, %v150_v16 }
  0x3a   :  { %1066 = vmatprep.subr.bf16.mxu1 %v1065_v0  ;;  %v1071_v21 = vpack.c.bf16 %v99_v14, %v96_v13  ;;  %v125_v23 = vld [vmem:[#allocation2 + $0x1b8] sm:$0xff]  ;;  %v102_v25 = vld [vmem:[#allocation2 + $0x100] sm:$0xff]  ;;  %v128_v27 = vld [vmem:[#allocation2 + $0x1d0] sm:$0xff]  ;;  %v959_v30 = vpack.c.bf16 %v121_v20, %v118_v19 }
  0x3b   :  { %944 = vmatpush1.bf16.msra.mxu0 %v943_v43  ;;  %v105_v26 = vld [vmem:[#allocation2 + $0x118] sm:$0xff]  ;;  %v156_v28 = vld [vmem:[#allocation2 + $0x2b0] sm:$0xff]  ;;  %v159_v29 = vld [vmem:[#allocation2 + $0x2c8] sm:$0xff]  ;;  %v961_v34 = vpack.c.bf16 %v128_v27, %v125_v23 }
  0x3c   :  { %946 = vmatprep.subr.bf16.mxu0 %v945_v47  ;;  %v124_v31 = vld [vmem:[#allocation2 + $0x1b0] sm:$0xff]  ;;  %v127_v32 = vld [vmem:[#allocation2 + $0x1c8] sm:$0xff]  ;;  %v1075_v33 = vpack.c.bf16 %v105_v26, %v102_v25  ;;  %v1077_v36 = vpack.c.bf16 %v159_v29, %v156_v28  ;;  %v134_v39 = vld [vmem:[#allocation2 + $0x200] sm:$0xff] }
  0x3d   :  { %1068 = vmatpush3.bf16.msra.mxu1 %v1067_v9  ;;  %v131_v35 = vld [vmem:[#allocation2 + $0x1e8] sm:$0xff]  ;;  %v108_v37 = vld [vmem:[#allocation2 + $0x130] sm:$0xff]  ;;  %v162_v40 = vld [vmem:[#allocation2 + $0x2e0] sm:$0xff]  ;;  %v963_v42 = vpack.c.bf16 %v127_v32, %v124_v31 }
  0x3e   :  { %1070 = vmatprep.subr.bf16.mxu1 %v1069_v12  ;;  %v111_v38 = vld [vmem:[#allocation2 + $0x148] sm:$0xff]  ;;  %v165_v41 = vld [vmem:[#allocation2 + $0x2f8] sm:$0xff]  ;;  %v130_v43 = vld [vmem:[#allocation2 + $0x1e0] sm:$0xff]  ;;  %v965_v46 = vpack.c.bf16 %v134_v39, %v131_v35 }
  0x3f   :  { %948 = vmatpush1.bf16.msra.mxu0 %v947_v57  ;;  %v133_v44 = vld [vmem:[#allocation2 + $0x1f8] sm:$0xff]  ;;  %v1079_v45 = vpack.c.bf16 %v111_v38, %v108_v37  ;;  %v1081_v48 = vpack.c.bf16 %v165_v41, %v162_v40  ;;  %v114_v49 = vld [vmem:[#allocation2 + $0x160] sm:$0xff]  ;;  %v140_v51 = vld [vmem:[#allocation2 + $0x230] sm:$0xff] }
  0x40   :  { %950 = vmatprep.subr.bf16.mxu0 %v949_v62  ;;  %v137_v47 = vld [vmem:[#allocation2 + $0x218] sm:$0xff]  ;;  %v216_v52 = vld [vmem:[#allocation2 + $0x490] sm:$0xff]  ;;  %v219_v53 = vld [vmem:[#allocation2 + $0x4a8] sm:$0xff]  ;;  %v967_v54 = vpack.c.bf16 %v133_v44, %v130_v43  ;;  %v1277_v44 = vmov 1.0  }
  0x41   :  { %1072 = vmatpush3.bf16.msra.mxu1 %v1071_v21  ;;  %v117_v50 = vld [vmem:[#allocation2 + $0x178] sm:$0xff]  ;;  %v969_v56 = vpack.c.bf16 %v140_v51, %v137_v47  ;;  %v136_v57 = vld [vmem:[#allocation2 + $0x210] sm:$0xff]  ;;  %v139_v58 = vld [vmem:[#allocation2 + $0x228] sm:$0xff]  ;;  %v1085_v59 = vpack.c.bf16 %v219_v53, %v216_v52 }
  0x42   :  { %1074 = vmatprep.subr.bf16.mxu1 %v1073_v24  ;;  %v1083_v55 = vpack.c.bf16 %v117_v50, %v114_v49  ;;  %v143_v60 = vld [vmem:[#allocation2 + $0x248] sm:$0xff]  ;;  %v146_v61 = vld [vmem:[#allocation2 + $0x260] sm:$0xff]  ;;  %v971_v62 = vpack.c.bf16 %v139_v58, %v136_v57  ;;  %v145_v1 = vld [vmem:[#allocation2 + $0x258] sm:$0xff]  ;;  %v50_v24 = vlaneseq }
  0x43   :  { %952 = vmatpush1.bf16.msra.mxu0 %v951_v6  ;;  %v973_v63 = vpack.c.bf16 %v146_v61, %v143_v60  ;;  %v142_v0 = vld [vmem:[#allocation2 + $0x240] sm:$0xff]  ;;  %v149_v2 = vld [vmem:[#allocation2 + $0x278] sm:$0xff]  ;;  %v152_v3 = vld [vmem:[#allocation2 + $0x290] sm:$0xff] }
  0x44   :  { %954 = vmatprep.subr.bf16.mxu0 %v953_v10  ;;  %v975_v4 = vpack.c.bf16 %v145_v1, %v142_v0  ;;  %v977_v5 = vpack.c.bf16 %v152_v3, %v149_v2  ;;  %v148_v6 = vld [vmem:[#allocation2 + $0x270] sm:$0xff]  ;;  %v151_v7 = vld [vmem:[#allocation2 + $0x288] sm:$0xff]  ;;  %v158_v9 = vld [vmem:[#allocation2 + $0x2c0] sm:$0xff]  ;;  %v1340_v25 = vand.u32 127, %v50_v24 }
  0x45   :  { %1076 = vmatpush3.bf16.msra.mxu1 %v1075_v33  ;;  %v155_v8 = vld [vmem:[#allocation2 + $0x2a8] sm:$0xff]  ;;  %v979_v10 = vpack.c.bf16 %v151_v7, %v148_v6  ;;  %v154_v12 = vld [vmem:[#allocation2 + $0x2a0] sm:$0xff]  ;;  %v157_v13 = vld [vmem:[#allocation2 + $0x2b8] sm:$0xff] }
  0x46   :  { %1078 = vmatprep.subr.bf16.mxu1 %v1077_v36  ;;  %v981_v11 = vpack.c.bf16 %v158_v9, %v155_v8  ;;  %v161_v14 = vld [vmem:[#allocation2 + $0x2d8] sm:$0xff]  ;;  %v164_v15 = vld [vmem:[#allocation2 + $0x2f0] sm:$0xff]  ;;  %v983_v16 = vpack.c.bf16 %v157_v13, %v154_v12  ;;  %v163_v19 = vld [vmem:[#allocation2 + $0x2e8] sm:$0xff]  ;;  %v52_v27 = vadd.s32 128, %v1340_v25  ;;  %v54_v38 = vadd.s32 384, %v1340_v25 }
  0x47   :  { %956 = vmatpush1.bf16.msra.mxu0 %v955_v18  ;;  %v985_v17 = vpack.c.bf16 %v164_v15, %v161_v14  ;;  %v160_v18 = vld [vmem:[#allocation2 + $0x2d0] sm:$0xff]  ;;  %v167_v20 = vld [vmem:[#allocation2 + $0x308] sm:$0xff]  ;;  %v170_v21 = vld [vmem:[#allocation2 + $0x320] sm:$0xff] }
  0x48   :  { %958 = vmatprep.subr.bf16.mxu0 %v957_v22  ;;  %v987_v22 = vpack.c.bf16 %v163_v19, %v160_v18  ;;  %v989_v23 = vpack.c.bf16 %v170_v21, %v167_v20  ;;  %v166_v26 = vld [vmem:[#allocation2 + $0x300] sm:$0xff]  ;;  %v169_v28 = vld [vmem:[#allocation2 + $0x318] sm:$0xff]  ;;  %v168_v29 = vld [vmem:[#allocation2 + $0x310] sm:$0xff] }
  0x49   :  { %1080 = vmatpush3.bf16.msra.mxu1 %v1079_v45  ;;  %v173_v31 = vld [vmem:[#allocation2 + $0x338] sm:$0xff]  ;;  %v176_v32 = vld [vmem:[#allocation2 + $0x350] sm:$0xff]  ;;  %v222_v33 = vld [vmem:[#allocation2 + $0x4c0] sm:$0xff]  ;;  %v991_v36 = vpack.c.bf16 %v169_v28, %v166_v26 }
  0x4a   :  { %1082 = vmatprep.subr.bf16.mxu1 %v1081_v48  ;;  %v172_v39 = vld [vmem:[#allocation2 + $0x330] sm:$0xff]  ;;  %v175_v40 = vld [vmem:[#allocation2 + $0x348] sm:$0xff]  ;;  %v174_v41 = vld [vmem:[#allocation2 + $0x340] sm:$0xff]  ;;  %v993_v45 = vpack.c.bf16 %v176_v32, %v173_v31 }
  0x4b   :  { %960 = vmatpush1.bf16.msra.mxu0 %v959_v30  ;;  %v171_v30 = vld [vmem:[#allocation2 + $0x328] sm:$0xff]  ;;  %v182_v47 = vld [vmem:[#allocation2 + $0x380] sm:$0xff]  ;;  %v228_v48 = vld [vmem:[#allocation2 + $0x4f0] sm:$0xff]  ;;  %v995_v50 = vpack.c.bf16 %v175_v40, %v172_v39 }
  0x4c   :  { %962 = vmatprep.subr.bf16.mxu0 %v961_v34  ;;  %v225_v34 = vld [vmem:[#allocation2 + $0x4d8] sm:$0xff]  ;;  %v1087_v37 = vpack.c.bf16 %v171_v30, %v168_v29  ;;  %v179_v43 = vld [vmem:[#allocation2 + $0x368] sm:$0xff]  ;;  %v178_v52 = vld [vmem:[#allocation2 + $0x360] sm:$0xff] }
  0x4d   :  { %1084 = vmatpush3.bf16.msra.mxu1 %v1083_v55  ;;  %v231_v49 = vld [vmem:[#allocation2 + $0x508] sm:$0xff]  ;;  %v181_v53 = vld [vmem:[#allocation2 + $0x378] sm:$0xff]  ;;  %v234_v60 = vld [vmem:[#allocation2 + $0x520] sm:$0xff] }
  0x4e   :  { %1086 = vmatprep.subr.bf16.mxu1 %v1085_v59  ;;  %v1093_v55 = vpack.c.bf16 %v231_v49, %v228_v48  ;;  %v183_v57 = vld [vmem:[#allocation2 + $0x388] sm:$0xff]  ;;  %v185_v58 = vld [vmem:[#allocation2 + $0x398] sm:$0xff]  ;;  %v188_v59 = vld [vmem:[#allocation2 + $0x3b0] sm:$0xff] }
  0x4f   :  { %964 = vmatpush1.bf16.msra.mxu0 %v963_v42  ;;  %v177_v42 = vld [vmem:[#allocation2 + $0x358] sm:$0xff]  ;;  %v184_v0 = vld [vmem:[#allocation2 + $0x390] sm:$0xff]  ;;  %v187_v1 = vld [vmem:[#allocation2 + $0x3a8] sm:$0xff]  ;;  %v1001_v2 = vpack.c.bf16 %v188_v59, %v185_v58 }
  0x50   :  { %966 = vmatprep.subr.bf16.mxu0 %v965_v46  ;;  %v1089_v46 = vpack.c.bf16 %v225_v34, %v222_v33  ;;  %v1091_v51 = vpack.c.bf16 %v177_v42, %v174_v41  ;;  %v237_v61 = vld [vmem:[#allocation2 + $0x538] sm:$0xff]  ;;  %v191_v6 = vld [vmem:[#allocation2 + $0x3c8] sm:$0xff]  ;;  %v194_v7 = vld [vmem:[#allocation2 + $0x3e0] sm:$0xff] }
  0x51   :  { %v1097_v3 = vpack.c.bf16 %v237_v61, %v234_v60  ;;  %v240_v8 = vld [vmem:[#allocation2 + $0x550] sm:$0xff]  ;;  %v243_v9 = vld [vmem:[#allocation2 + $0x568] sm:$0xff]  ;;  %v190_v12 = vld [vmem:[#allocation2 + $0x3c0] sm:$0xff]  ;;  %v1005_v14 = vpack.c.bf16 %v194_v7, %v191_v6  ;;  %v1357_v7 = vadd.s32 256, %v1340_v25 }
  0x52   :  { %v193_v13 = vld [vmem:[#allocation2 + $0x3d8] sm:$0xff]  ;;  %v1101_v15 = vpack.c.bf16 %v243_v9, %v240_v8  ;;  %v200_v19 = vld [vmem:[#allocation2 + $0x410] sm:$0xff]  ;;  %v246_v20 = vld [vmem:[#allocation2 + $0x580] sm:$0xff] }
  0x53   :  { %968 = vmatpush1.bf16.msra.mxu0 %v967_v54  ;;  %v997_v54 = vpack.c.bf16 %v182_v47, %v179_v43  ;;  %v197_v18 = vld [vmem:[#allocation2 + $0x3f8] sm:$0xff]  ;;  %v196_v26 = vld [vmem:[#allocation2 + $0x3f0] sm:$0xff]  ;;  %v198_v30 = vld [vmem:[#allocation2 + $0x400] sm:$0xff] }
  0x54   :  { %970 = vmatprep.subr.bf16.mxu0 %v969_v56  ;;  %v180_v56 = vld [vmem:[#allocation2 + $0x370] sm:$0xff]  ;;  %v249_v21 = vld [vmem:[#allocation2 + $0x598] sm:$0xff]  ;;  %v1009_v28 = vpack.c.bf16 %v200_v19, %v197_v18  ;;  %v203_v32 = vld [vmem:[#allocation2 + $0x428] sm:$0xff] }
  0x55   :  { %v1105_v29 = vpack.c.bf16 %v249_v21, %v246_v20  ;;  %v201_v31 = vld [vmem:[#allocation2 + $0x418] sm:$0xff]  ;;  %v206_v33 = vld [vmem:[#allocation2 + $0x440] sm:$0xff]  ;;  %v252_v34 = vld [vmem:[#allocation2 + $0x5b0] sm:$0xff] }
  0x56   :  { %v202_v39 = vld [vmem:[#allocation2 + $0x420] sm:$0xff]  ;;  %v205_v40 = vld [vmem:[#allocation2 + $0x438] sm:$0xff]  ;;  %v1013_v41 = vpack.c.bf16 %v206_v33, %v203_v32  ;;  %v204_v43 = vld [vmem:[#allocation2 + $0x430] sm:$0xff] }
  0x57   :  { %972 = vmatpush1.bf16.msra.mxu0 %v971_v62  ;;  %v999_v62 = vpack.c.bf16 %v181_v53, %v178_v52  ;;  %v212_v47 = vld [vmem:[#allocation2 + $0x470] sm:$0xff]  ;;  %v258_v48 = vld [vmem:[#allocation2 + $0x5e0] sm:$0xff]  ;;  %v261_v49 = vld [vmem:[#allocation2 + $0x5f8] sm:$0xff] }
  0x58   :  { %974 = vmatprep.subr.bf16.mxu0 %v973_v63  ;;  %v1095_v63 = vpack.c.bf16 %v183_v57, %v180_v56  ;;  %v208_v52 = vld [vmem:[#allocation2 + $0x450] sm:$0xff]  ;;  %v211_v53 = vld [vmem:[#allocation2 + $0x468] sm:$0xff]  ;;  %v210_v56 = vld [vmem:[#allocation2 + $0x460] sm:$0xff] }
  0x59   :  { %v213_v57 = vld [vmem:[#allocation2 + $0x478] sm:$0xff]  ;;  %v215_v58 = vld [vmem:[#allocation2 + $0x488] sm:$0xff]  ;;  %v218_v59 = vld [vmem:[#allocation2 + $0x4a0] sm:$0xff] }
  0x5a   :  { %v546_v60 = vld [vmem:[#allocation5 + $0x8] sm:$0xff]  ;;  %v549_v61 = vld [vmem:[#allocation5 + $0x20] sm:$0xff]  ;;  %v221_v6 = vld [vmem:[#allocation2 + $0x4b8] sm:$0xff] }
  0x5b   :  { %976 = vmatpush1.bf16.msra.mxu0 %v975_v4  ;;  %v186_v4 = vld [vmem:[#allocation2 + $0x3a0] sm:$0xff]  ;;  %v224_v8 = vld [vmem:[#allocation2 + $0x4d0] sm:$0xff]  ;;  %v552_v9 = vld [vmem:[#allocation5 + $0x38] sm:$0xff] }
  0x5c   :  { %978 = vmatprep.subr.bf16.mxu0 %v977_v5  ;;  %v189_v5 = vld [vmem:[#allocation2 + $0x3b8] sm:$0xff]  ;;  %v554_v18 = vld [vmem:[#allocation5 + $0x48] sm:$0xff]  ;;  %v561_v21 = vld [vmem:[#allocation5 + $0x80] sm:$0xff] }
  0x5d   :  { %v227_v19 = vld [vmem:[#allocation2 + $0x4e8] sm:$0xff]  ;;  %v233_v32 = vld [vmem:[#allocation2 + $0x518] sm:$0xff]  ;;  %v236_v33 = vld [vmem:[#allocation2 + $0x530] sm:$0xff] }
  0x5e   :  { %v558_v20 = vld [vmem:[#allocation5 + $0x68] sm:$0xff] }
  0x5f   :  { %980 = vmatpush1.bf16.msra.mxu0 %v979_v10  ;;  %v1003_v10 = vpack.c.bf16 %v187_v1, %v184_v0  ;;  %v214_v0 = vld [vmem:[#allocation2 + $0x480] sm:$0xff]  ;;  %v217_v1 = vld [vmem:[#allocation2 + $0x498] sm:$0xff] }
  0x60   :  { %982 = vmatprep.subr.bf16.mxu0 %v981_v11  ;;  %v1099_v11 = vpack.c.bf16 %v189_v5, %v186_v4  ;;  %v545_v4 = vld [vmem:[#allocation5] sm:$0xff]  ;;  %v548_v5 = vld [vmem:[#allocation5 + $0x18] sm:$0xff] }
  0x63   :  { %984 = vmatpush1.bf16.msra.mxu0 %v983_v16  ;;  %v192_v16 = vld [vmem:[#allocation2 + $0x3d0] sm:$0xff] }
  0x64   :  { %986 = vmatprep.subr.bf16.mxu0 %v985_v17  ;;  %v195_v17 = vld [vmem:[#allocation2 + $0x3e8] sm:$0xff] }
  0x67   :  { %988 = vmatpush1.bf16.msra.mxu0 %v987_v22  ;;  %v1007_v22 = vpack.c.bf16 %v193_v13, %v190_v12  ;;  %v1119_v12 = vpack.c.bf16 %v548_v5, %v545_v4  ;;  %v220_v13 = vld [vmem:[#allocation2 + $0x4b0] sm:$0xff] }
  0x68   :  { %990 = vmatprep.subr.bf16.mxu0 %v989_v23  ;;  %v1103_v23 = vpack.c.bf16 %v195_v17, %v192_v16  ;;  %v551_v17 = vld [vmem:[#allocation5 + $0x30] sm:$0xff] }
  0x69   :  { %v575_v5 = vld [vmem:[#allocation5 + $0xf0] sm:$0xff] }
  0xa7   :  { %v1343_v35 = vpop.permute.xlu0 %56 }
  0xa8   :  { %vm59_vm0 = vcmp.eq.s32.totalorder %v52_v27, %v1343_v35  ;;  %vm58_vm1 = vcmp.eq.s32.totalorder %v1340_v25, %v1343_v35  ;;  %vm61_vm2 = vcmp.eq.s32.totalorder %v54_v38, %v1343_v35  ;;  %v199_v27 = vld [vmem:[#allocation2 + $0x408] sm:$0xff]  ;;  %v1107_v38 = vpack.c.bf16 %v201_v31, %v198_v30  ;;  %v230_v25 = vld [vmem:[#allocation2 + $0x500] sm:$0xff]  ;;  %v560_v31 = vld [vmem:[#allocation5 + $0x78] sm:$0xff] }
  0xa9   :  { %793 = vmatprep.mubr.msk.f32.mxu0 %vm59_vm0, %v1277_v44  ;;  %797 = vmatprep.mubr.msk.f32.mxu1 %vm59_vm0, %v1277_v44  ;;  %vm60_vm3 = vcmp.eq.s32.totalorder %v1357_v7, %v1343_v35  ;;  %v557_v30 = vld [vmem:[#allocation5 + $0x60] sm:$0xff]  ;;  %v571_v35 = vld [vmem:[#allocation5 + $0xd0] sm:$0xff] }
  0xaa   :  { %794 = vmatmul.mubr.msk.f32.vlgmr.msra.gmra.mrb[0].mxu0 %vm58_vm1, %v1277_v44  ;;  %798 = vmatmul.mubr.msk.f32.vlgmr.msra.gmra.mrb[0].mxu1 %vm58_vm1, %v1277_v44 }
  0xab   :  { %992 = vmatpush1.bf16.msra.mxu0 %v991_v36  ;;  %1088 = vmatpush3.bf16.msra.mxu1 %v1087_v37  ;;  %v255_v36 = vld [vmem:[#allocation2 + $0x5c8] sm:$0xff]  ;;  %v1011_v37 = vpack.c.bf16 %v199_v27, %v196_v26  ;;  %v226_v26 = vld [vmem:[#allocation2 + $0x4e0] sm:$0xff]  ;;  %v229_v27 = vld [vmem:[#allocation2 + $0x4f8] sm:$0xff] }
  0xac   :  { %795 = vmatprep.mubr.msk.f32.mxu0 %vm61_vm2, %v1277_v44  ;;  %799 = vmatprep.mubr.msk.f32.mxu1 %vm61_vm2, %v1277_v44  ;;  %v1109_v42 = vpack.c.bf16 %v255_v36, %v252_v34  ;;  %v564_v34 = vld [vmem:[#allocation5 + $0x98] sm:$0xff]  ;;  %v567_v36 = vld [vmem:[#allocation5 + $0xb0] sm:$0xff] }
  0xad   :  { %994 = vmatprep.subr.bf16.mxu0 %v993_v45  ;;  %1090 = vmatprep.subr.bf16.mxu1 %v1089_v46  ;;  %v207_v45 = vld [vmem:[#allocation2 + $0x448] sm:$0xff]  ;;  %v209_v46 = vld [vmem:[#allocation2 + $0x458] sm:$0xff] }
  0xaf   :  { %996 = vmatpush1.bf16.msra.mxu0 %v995_v50  ;;  %1092 = vmatpush3.bf16.msra.mxu1 %v1091_v51  ;;  %v1015_v50 = vpack.c.bf16 %v205_v40, %v202_v39  ;;  %v1111_v51 = vpack.c.bf16 %v207_v45, %v204_v43  ;;  %v1127_v39 = vpack.c.bf16 %v560_v31, %v557_v30  ;;  %v232_v40 = vld [vmem:[#allocation2 + $0x510] sm:$0xff]  ;;  %v259_v30 = vld [vmem:[#allocation2 + $0x5e8] sm:$0xff] }
  0xb0   :  { %998 = vmatprep.subr.bf16.mxu0 %v997_v54  ;;  %1094 = vmatprep.subr.bf16.mxu1 %v1093_v55  ;;  %v1017_v54 = vpack.c.bf16 %v212_v47, %v209_v46  ;;  %v1113_v55 = vpack.c.bf16 %v261_v49, %v258_v48  ;;  %v1129_v43 = vpack.c.bf16 %v567_v36, %v564_v34  ;;  %v563_v45 = vld [vmem:[#allocation5 + $0x90] sm:$0xff]  ;;  %v566_v46 = vld [vmem:[#allocation5 + $0xa8] sm:$0xff]  ;;  %v242_v48 = vld [vmem:[#allocation2 + $0x560] sm:$0xff] }
  0xb1   :  { %v239_v47 = vld [vmem:[#allocation2 + $0x548] sm:$0xff]  ;;  %v587_v31 = vld [vmem:[#allocation5 + $0x150] sm:$0xff] }
  0xb2   :  { %v570_v49 = vld [vmem:[#allocation5 + $0xc8] sm:$0xff]  ;;  %v547_v36 = vld [vmem:[#allocation5 + $0x10] sm:$0xff] }
  0xb3   :  { %1000 = vmatpush1.bf16.msra.mxu0 %v999_v62  ;;  %1096 = vmatpush3.bf16.msra.mxu1 %v1095_v63  ;;  %v1019_v62 = vpack.c.bf16 %v211_v53, %v208_v52  ;;  %v1115_v63 = vpack.c.bf16 %v213_v57, %v210_v56  ;;  %v1131_v52 = vpack.c.bf16 %v566_v46, %v563_v45  ;;  %v238_v53 = vld [vmem:[#allocation2 + $0x540] sm:$0xff]  ;;  %v559_v46 = vld [vmem:[#allocation5 + $0x70] sm:$0xff] }
  0xb4   :  { %1002 = vmatprep.subr.bf16.mxu0 %v1001_v2  ;;  %1098 = vmatprep.subr.bf16.mxu1 %v1097_v3  ;;  %v1021_v2 = vpack.c.bf16 %v218_v59, %v215_v58  ;;  %v1117_v3 = vpack.c.bf16 %v549_v61, %v546_v60  ;;  %v569_v57 = vld [vmem:[#allocation5 + $0xc0] sm:$0xff]  ;;  %v572_v58 = vld [vmem:[#allocation5 + $0xd8] sm:$0xff]  ;;  %v248_v60 = vld [vmem:[#allocation2 + $0x590] sm:$0xff] }
  0xb5   :  { %v245_v59 = vld [vmem:[#allocation2 + $0x578] sm:$0xff] }
  0xb6   :  { %v576_v61 = vld [vmem:[#allocation5 + $0xf8] sm:$0xff] }
  0xb7   :  { %1004 = vmatpush1.bf16.msra.mxu0 %v1003_v10  ;;  %1100 = vmatpush3.bf16.msra.mxu1 %v1099_v11  ;;  %v555_v10 = vld [vmem:[#allocation5 + $0x50] sm:$0xff]  ;;  %v1023_v11 = vpack.c.bf16 %v217_v1, %v214_v0  ;;  %v1135_v0 = vpack.c.bf16 %v572_v58, %v569_v57  ;;  %v589_v57 = vld [vmem:[#allocation5 + $0x160] sm:$0xff]  ;;  %v592_v58 = vld [vmem:[#allocation5 + $0x178] sm:$0xff] }
  0xb8   :  { %1006 = vmatprep.subr.bf16.mxu0 %v1005_v14  ;;  %1102 = vmatprep.subr.bf16.mxu1 %v1101_v15  ;;  %v223_v14 = vld [vmem:[#allocation2 + $0x4c8] sm:$0xff]  ;;  %v1025_v15 = vpack.c.bf16 %v224_v8, %v221_v6  ;;  %v1121_v16 = vpack.c.bf16 %v555_v10, %v552_v9  ;;  %v244_v1 = vld [vmem:[#allocation2 + $0x570] sm:$0xff]  ;;  %v254_v9 = vld [vmem:[#allocation2 + $0x5c0] sm:$0xff] }
  0xb9   :  { %v578_v6 = vld [vmem:[#allocation5 + $0x108] sm:$0xff] }
  0xba   :  { %v251_v8 = vld [vmem:[#allocation2 + $0x5a8] sm:$0xff] }
  0xbb   :  { %1008 = vmatpush1.bf16.msra.mxu0 %v1007_v22  ;;  %1104 = vmatpush3.bf16.msra.mxu1 %v1103_v23  ;;  %v1027_v22 = vpack.c.bf16 %v223_v14, %v220_v13  ;;  %v1123_v23 = vpack.c.bf16 %v554_v18, %v551_v17  ;;  %v582_v10 = vld [vmem:[#allocation5 + $0x128] sm:$0xff]  ;;  %v1139_v13 = vpack.c.bf16 %v578_v6, %v575_v5  ;;  %v250_v14 = vld [vmem:[#allocation2 + $0x5a0] sm:$0xff]  ;;  %v593_v5 = vld [vmem:[%s1398_s3] sm:$0x7]  ;;  %s1281_s3 = smov [#allocation7]  }
  0xbc   :  { %1010 = vmatprep.subr.bf16.mxu0 %v1009_v28  ;;  %1106 = vmatprep.subr.bf16.mxu1 %v1105_v29  ;;  %v1029_v28 = vpack.c.bf16 %v230_v25, %v227_v19  ;;  %v1125_v29 = vpack.c.bf16 %v561_v21, %v558_v20  ;;  %v581_v18 = vld [vmem:[#allocation5 + $0x120] sm:$0xff]  ;;  %v584_v19 = vld [vmem:[#allocation5 + $0x138] sm:$0xff]  ;;  %v260_v20 = vld [vmem:[#allocation2 + $0x5f0] sm:$0xff]  ;;  %s779_s21 = sshll.u32 %s1281_s3, 4  ;;  %s780_s21 = int_to_ptr.vmem [resolvable:$true] %s779_s21 }
  0xbd   :  { %v257_v25 = vld [vmem:[#allocation2 + $0x5d8] sm:$0xff]  ;;  %s1244_s22 = scalar_lea.vmem %s780_s21, 128  ;;  %p1249_p3 = scmp.lt.s32.totalorder %s780_s21, %s780_s21 }
  0xbe   :  { %v588_v21 = vld [vmem:[#allocation5 + $0x158] sm:$0xff]  ;;  %p1245_p2 = scmp.ne.s32.totalorder %s780_s21, %s1244_s22  ;;  %p1250_p4 = scmp.lt.s32.totalorder %s1244_s22, %s1244_s22 }
  0xbf   :  { %1012 = vmatpush1.bf16.msra.mxu0 %v1011_v37  ;;  %1108 = vmatpush3.bf16.msra.mxu1 %v1107_v38  ;;  %v1278_v37 = vmov 0.0   ;;  %v1031_v38 = vpack.c.bf16 %v229_v27, %v226_v26  ;;  %v1143_v26 = vpack.c.bf16 %v584_v19, %v581_v18  ;;  %v256_v27 = vld [vmem:[#allocation2 + $0x5d0] sm:$0xff] }
  0xc0   :  { %1014 = vmatprep.subr.bf16.mxu0 %v1013_v41  ;;  %1110 = vmatprep.subr.bf16.mxu1 %v1109_v42  ;;  %v235_v41 = vld [vmem:[#allocation2 + $0x528] sm:$0xff]  ;;  %v1033_v42 = vpack.c.bf16 %v236_v33, %v233_v32  ;;  %v1051_v33 = vpack.c.bf16 %v259_v30, %v256_v27  ;;  %p1251_p5 = por %p1250_p4, %p1249_p3 }
  0xc1   :  { %v590_v32 = vld [vmem:[#allocation5 + $0x168] sm:$0xff] }
  0xc2   :  { %v1147_v34 = vpack.c.bf16 %v590_v32, %v587_v31  ;;  %p1252_p6 = pnand %p1251_p5, %p1245_p2 }
  0xc3   :  { %1016 = vmatpush1.bf16.msra.mxu0 %v1015_v50  ;;  %1112 = vmatpush3.bf16.msra.mxu1 %v1111_v51  ;;  %v573_v50 = vld [vmem:[#allocation5 + $0xe0] sm:$0xff]  ;;  %v1035_v51 = vpack.c.bf16 %v235_v41, %v232_v40  ;;  %v1279_v41 = vmov 0.0|0.0  }
  0xc4   :  { %1018 = vmatprep.subr.bf16.mxu0 %v1017_v54  ;;  %1114 = vmatprep.subr.bf16.mxu1 %v1113_v55  ;;  %v241_v54 = vld [vmem:[#allocation2 + $0x558] sm:$0xff]  ;;  %v1037_v55 = vpack.c.bf16 %v242_v48, %v239_v47  ;;  %v1133_v56 = vpack.c.bf16 %v573_v50, %v570_v49  ;;  %v562_v47 = vld [vmem:[#allocation5 + $0x88] sm:$0xff]  ;;  %v565_v49 = vld [vmem:[#allocation5 + $0xa0] sm:$0xff] }
  0xc5   :  { %v1156_v48 = vpack.c.bf16 %v562_v47, %v559_v46  ;;  %v568_v50 = vld [vmem:[#allocation5 + $0xb8] sm:$0xff] }
  0xc7   :  { %1020 = vmatpush1.bf16.msra.mxu0 %v1019_v62  ;;  %1116 = vmatpush3.bf16.msra.mxu1 %v1115_v63  ;;  %v579_v62 = vld [vmem:[#allocation5 + $0x110] sm:$0xff]  ;;  %v1039_v63 = vpack.c.bf16 %v241_v54, %v238_v53  ;;  %v580_v53 = vld [vmem:[#allocation5 + $0x118] sm:$0xff] }
  0xc8   :  { %1022 = vmatprep.subr.bf16.mxu0 %v1021_v2  ;;  %1118 = vmatprep.subr.bf16.mxu1 %v1117_v3  ;;  %v247_v2 = vld [vmem:[#allocation2 + $0x588] sm:$0xff]  ;;  %v1041_v3 = vpack.c.bf16 %v248_v60, %v245_v59  ;;  %v1137_v4 = vpack.c.bf16 %v579_v62, %v576_v61  ;;  %v583_v54 = vld [vmem:[#allocation5 + $0x130] sm:$0xff]  ;;  %v1171_v59 = vpack.c.bf16 %v592_v58, %v589_v57 }
  0xca   :  { %800 = vmatmul.mubr.msk.f32.vlgmr.msra.gmra.mrb[2].mxu1 %vm60_vm3, %v1277_v44 }
  0xcb   :  { %1024 = vmatpush1.bf16.msra.mxu0 %v1023_v11  ;;  %1120 = vmatpush1.bf16.msra.mxu1 %v1119_v12  ;;  %v585_v11 = vld [vmem:[#allocation5 + $0x140] sm:$0xff]  ;;  %v1043_v12 = vpack.c.bf16 %v247_v2, %v244_v1 }
  0xcc   :  { %1026 = vmatprep.subr.bf16.mxu0 %v1025_v15  ;;  %1122 = vmatprep.subr.bf16.mxu1 %v1121_v16  ;;  %v253_v15 = vld [vmem:[#allocation2 + $0x5b8] sm:$0xff]  ;;  %v1045_v16 = vpack.c.bf16 %v254_v9, %v251_v8  ;;  %v1141_v17 = vpack.c.bf16 %v585_v11, %v582_v10 }
  0xcd   :  { %674 = vmatprep.mubr.f32.mxu1 %v1278_v37 }
  0xcf   :  { %1028 = vmatpush1.bf16.msra.mxu0 %v1027_v22  ;;  %1124 = vmatpush1.bf16.msra.mxu1 %v1123_v23  ;;  %v591_v22 = vld [vmem:[#allocation5 + $0x170] sm:$0xff]  ;;  %v1047_v23 = vpack.c.bf16 %v253_v15, %v250_v14 }
  0xd0   :  { %1030 = vmatprep.subr.bf16.mxu0 %v1029_v28  ;;  %1126 = vmatprep.subr.bf16.mxu1 %v1125_v29  ;;  %v1049_v28 = vpack.c.bf16 %v260_v20, %v257_v25  ;;  %v1145_v29 = vpack.c.bf16 %v591_v22, %v588_v21 }
  0xd3   :  { %1032 = vmatpush1.bf16.msra.mxu0 %v1031_v38  ;;  %1128 = vmatpush1.bf16.msra.mxu1 %v1127_v39  ;;  %v550_v38 = vld [vmem:[#allocation5 + $0x28] sm:$0xff]  ;;  %v1369_v39 = vld [vmem:[%s1399_s4] sm:$0xff] }
  0xd4   :  { %1034 = vmatprep.subr.bf16.mxu0 %v1033_v42  ;;  %1130 = vmatprep.subr.bf16.mxu1 %v1129_v43  ;;  %v1150_v40 = vpack.c.bf16 %v550_v38, %v547_v36  ;;  %v553_v42 = vld [vmem:[#allocation5 + $0x40] sm:$0xff]  ;;  %v556_v43 = vld [vmem:[#allocation5 + $0x58] sm:$0xff] }
  0xd5   :  { %v1153_v45 = vpack.c.bf16 %v556_v43, %v553_v42 }
  0xd7   :  { %1036 = vmatpush1.bf16.msra.mxu0 %v1035_v51  ;;  %1132 = vmatpush1.bf16.msra.mxu1 %v1131_v52  ;;  %v1159_v51 = vpack.c.bf16 %v568_v50, %v565_v49  ;;  %v577_v52 = vld [vmem:[#allocation5 + $0x100] sm:$0xff] }
  0xd8   :  { %1038 = vmatprep.subr.bf16.mxu0 %v1037_v55  ;;  %1134 = vmatprep.subr.bf16.mxu1 %v1133_v56  ;;  %v586_v55 = vld [vmem:[#allocation5 + $0x148] sm:$0xff] }
  0xd9   :  { %v1168_v56 = vpack.c.bf16 %v586_v55, %v583_v54 }
  0xdb   :  { %1040 = vmatpush1.bf16.msra.mxu0 %v1039_v63  ;;  %1136 = vmatpush1.bf16.msra.mxu1 %v1135_v0 }
  0xdc   :  { %1042 = vmatprep.subr.bf16.mxu0 %v1041_v3  ;;  %1138 = vmatprep.subr.bf16.mxu1 %v1137_v4  ;;  %v596_v3 = vshrl.u32 %v50_v24, 7 }
  0xde   :  { %v597_v4 = vsub.s32 0, %v596_v3  ;;  %v601_v6 = vsub.s32 1, %v596_v3  ;;  %v605_v20 = vsub.s32 2, %v596_v3 }
  0xdf   :  { %1044 = vmatpush1.bf16.msra.mxu0 %v1043_v12  ;;  %1140 = vmatpush1.bf16.msra.mxu1 %v1139_v13 }
  0xe0   :  { %1046 = vmatprep.subr.bf16.mxu0 %v1045_v16  ;;  %1142 = vmatprep.subr.bf16.mxu1 %v1141_v17  ;;  %v598_v8 = vrot.slane %v593_v5, %v597_v4  ;;  %v602_v9 = vrot.slane %v593_v5, %v601_v6  ;;  %v606_v22 = vrot.slane %v593_v5, %v605_v20 }
  0xe3   :  { %1048 = vmatpush1.bf16.msra.mxu0 %v1047_v23  ;;  %1144 = vmatpush1.bf16.msra.mxu1 %v1143_v26 }
  0xe4   :  { %1050 = vmatprep.subr.bf16.mxu0 %v1049_v28  ;;  %1146 = vmatprep.subr.bf16.mxu1 %v1145_v29 }
  0xe7   :  { %1052 = vmatpush1.bf16.msra.mxu0 %v1051_v33  ;;  %1148 = vmatpush1.bf16.msra.mxu1 %v1147_v34 }
  0xe8   :  { %1149 = vmatprep.subr.bf16.mxu1 %v1279_v41 }
  0xea   :  { %796 = vmatmul.mubr.msk.f32.vlgmr.msra.gmra.mrb[0].mxu0 %vm60_vm3, %v1277_v44  ;;  %675 = vmatmul.mubr.f32.vlgmr.msra.gmra.mrb[4].mxu1 %v1369_v39  ;;  %v574_v44 = vld [vmem:[#allocation5 + $0xe8] sm:$0xff] }
  0xeb   :  { %1151 = vmatpush3.bf16.msra.mxu1 %v1150_v40  ;;  %922 = vmatprep.mubr.msk.f32.mxu1 %vm1280_vm4, %v1278_v37  ;;  %v1162_v7 = vpack.c.bf16 %v574_v44, %v571_v35  ;;  %v1165_v37 = vpack.c.bf16 %v580_v53, %v577_v52 }
  0xec   :  { %1152 = vmatprep.subr.bf16.mxu1 %v1279_v41 }
  0xef   :  { %1154 = vmatpush3.bf16.msra.mxu1 %v1153_v45 }
  0xf0   :  { %1155 = vmatprep.subr.bf16.mxu1 %v1279_v41 }
  0xf3   :  { %1157 = vmatpush3.bf16.msra.mxu1 %v1156_v48 }
  0xf4   :  { %1158 = vmatprep.subr.bf16.mxu1 %v1279_v41 }
  0xf7   :  { %1160 = vmatpush3.bf16.msra.mxu1 %v1159_v51 }
  0xf8   :  { %1161 = vmatprep.subr.bf16.mxu1 %v1279_v41 }
  0xfb   :  { %1163 = vmatpush3.bf16.msra.mxu1 %v1162_v7 }
  0xfc   :  { %1164 = vmatprep.subr.bf16.mxu1 %v1279_v41 }
  0xff   :  { %1166 = vmatpush3.bf16.msra.mxu1 %v1165_v37 }
 0x100   :  { %1167 = vmatprep.subr.bf16.mxu1 %v1279_v41 }
 0x103   :  { %1169 = vmatpush3.bf16.msra.mxu1 %v1168_v56 }
 0x104   :  { %1170 = vmatprep.subr.bf16.mxu1 %v1279_v41 }
 0x107   :  { %1172 = vmatpush3.bf16.msra.mxu1 %v1171_v59 }
 0x10a   :  { %923 = vmatmul.mubr.f32.vlgmr.msra.gmra.mrb[6].mxu1 %v1369_v39 }
 0x17d   :  { %v835_v60 = vpop.f32.mrb[0].mxu1 }
 0x17e   :  { %v836_v61 = vpop.f32.mrb[1].mxu1 }
 0x17f   :  { %v837_v62 = vadd.f32 %v836_v61, %v835_v60 }
 0x19d   :  { %v870_v63 = vpop.f32.mrb[2].mxu1 }
 0x19e   :  { %v871_v0 = vpop.f32.mrb[3].mxu1 }
 0x19f   :  { %v872_v1 = vadd.f32 %v871_v0, %v870_v63 }
 0x1a1   :  { %v541_v2 = vadd.f32 %v872_v1, %v837_v62 }
 0x1bd   :  { %v399_v10 = vpop.f32.mrb[0].mxu0  ;;  %v676_v11 = vpop.f32.mrb[4].mxu1 }
 0x1be   :  { %v1173_v12 = vadd.f32 %v598_v8, %v399_v10  ;;  %v401_v13 = vpop.f32.mrb[1].mxu0  ;;  %v678_v14 = vpop.f32.mrb[5].mxu1 }
 0x1bf   :  { %v1175_v15 = vadd.f32 %v602_v9, %v401_v13 }
 0x1c0   :  { %v1174_v16 = vadd.f32 %v1173_v12, %v676_v11 }
 0x1c1   :  { %v1176_v17 = vadd.f32 %v1175_v15, %v678_v14 }
 0x1c2   :  { %v801_v18 = vmul.f32 -1.442695, %v1174_v16 }
 0x1c3   :  { %v802_v19 = vmul.f32 -1.442695, %v1176_v17 }
 0x1c4   :  { %1190 = vpow2.f32 %v801_v18 }
 0x1c5   :  { %1192 = vpow2.f32 %v802_v19 }
 0x1ce   :  { %v1191_v24 = vpop.eup %1190 }
 0x1cf   :  { %v755_v25 = vadd.f32 1.0, %v1191_v24  ;;  %v1193_v21 = vpop.eup %1192 }
 0x1d0   :  { %v762_v23 = vadd.f32 1.0, %v1193_v21 }
 0x1d1   :  { %1194 = vrcp.f32 %v755_v25 }
 0x1d2   :  { %1196 = vrcp.f32 %v762_v23 }
 0x1db   :  { %v1195_v29 = vpop.eup %1194 }
 0x1dc   :  { %v1197_v32 = vpop.eup %1196 }
 0x1dd   :  { %v747_v26 = vpop.f32.mrb[6].mxu1  ;;  %v768_v33 = vsub.f32 1.0, %v1197_v32  ;;  %v770_v38 = vmul.f32 %v1197_v32, %v1369_v39 }
 0x1de   :  { %v748_v27 = vadd.f32 %v747_v26, %v606_v22  ;;  %v924_v28 = vpop.f32.mrb[7].mxu1 }
 0x1e0   :  { %v765_v30 = vmul.f32 %v1195_v29, %v748_v27 }
 0x1e2   :  { %v766_v31 = vadd.f32 %v765_v30, %v541_v2 }
 0x1e4   :  { %1198 = vtanh.f32 %v766_v31 }
 0x1ee   :  { %v1199_v34 = vpop.eup %1198 }
 0x1ef   :  { %v769_v36 = vmul.f32 %v1199_v34, %v768_v33 }
 0x1f1   :  { %v771_v40 = vadd.f32 %v770_v38, %v769_v36 }
 0x1f3   :  { %772 = vst [vmem:[#allocation7] sm:$0xff] %v771_v40 }
 0x1f4   :  { %1255 = shalt.err (!%p1252_p6)
}
 0x1f5   :  { %s1256_s25 = scalar_lea.hbm %s1400_s5, 128 }
 0x1f6   :  { %p1257_p7 = scmp.ne.s32.totalorder %s1400_s5, %s1256_s25  ;;  %p1260_p8 = scmp.lt.u32.totalorder %s1256_s25, %s1400_s5 }
 0x1f8   :  { %p1262_p9 = pnand %p1260_p8, %p1257_p7 }
 0x1fa   :  { %1265 = shalt.err (!%p1262_p9)
}
 0x1fb   :  { %782 = dma.vmem_to_hbm [thread:$0]  %s780_s21, 128, %s1400_s5, [#allocation4]  }
 0x1fc   :  { %1270 = dma.done.wait [#allocation4], 128  }
 0x1fd   :  { %1271 = vsyncadd [#allocation4], 4294967168 }
 0x1fe   :  { %786 = vsyncpa [#allocation3], 1 }
 0x1ff   :  { %787 = vsyncpa [#allocation6], 1 }
 0x200   :  { %788 = vsyncpa [#allocation4], 1 }

</bundles_post_ra>
